<compile_context>
chip_gen: v6e
topology: v6e:2x2x1
jax: 0.10.0
libtpu: 0.0.40
codegen_flags: <defaults>
</compile_context>

<pallas_src>
import functools
import math

import jax
import jax.numpy as jnp
from jax.experimental import pallas as pl
from jax.experimental.pallas import tpu as pltpu


def _round_up(x, m):
    return ((x + m - 1) // m) * m


# Lane width of the packed block-diagonal head matmul.  VMEM-only; the HBM
# writeback is sliced to round_up(action_dim + 1, 8) lanes.
_OUT_VMEM = 128


def _ppo_kernel(obs_ref,
                w_enc_ref, b_enc_ref,
                w_ac1_ref, b_ac1_ref,
                w_out_ref, b_out_ref,
                out_ref, *, action_dim, mxu_dtype):
    out_small = out_ref.shape[1]

    x = obs_ref[...].astype(mxu_dtype)                          # (TB, obs_dim)

    # encoder: Linear + Tanh (K = obs_dim; MXU pads K internally, no HBM pad)
    h = jnp.tanh(
        jnp.dot(x, w_enc_ref[...], preferred_element_type=jnp.float32)
        + b_enc_ref[...]
    )                                                           # (TB, H) f32

    # fused actor/critic first layers: one lane-dense (H, 2H) matmul + tanh
    ac = jnp.tanh(
        jnp.dot(h.astype(mxu_dtype), w_ac1_ref[...],
                preferred_element_type=jnp.float32)
        + b_ac1_ref[...]
    )                                                           # (TB, 2H) f32

    # fused output heads: block-diagonal (2H, 128) matmul, lane-dense in VMEM.
    # lanes [0, action_dim)   -> actor logits (need final tanh)
    # lane  action_dim        -> critic value (linear)
    # only the first out_small lanes are written back to HBM.
    y = (jnp.dot(ac.astype(mxu_dtype), w_out_ref[...],
                 preferred_element_type=jnp.float32)
         + b_out_ref[...])[:, :out_small]                       # (TB, out_small)

    lane = jax.lax.broadcasted_iota(jnp.int32, y.shape, dimension=1)
    y = jnp.where(lane < action_dim, jnp.tanh(y), y)            # tanh actor lanes only

    out_ref[...] = y.astype(out_ref.dtype)                      # slim writeback


def pack_params(params, *, mxu_dtype=jnp.bfloat16):
    """One-time packing of PPOActorCritic parameters for the fused kernel.

    Weights are stored in mxu_dtype (bf16 by default; MXU accumulates in f32
    on all generations), biases stay f32 for the VPU/EUP path.
    """
    f32 = jnp.float32
    obs_dim, hidden = params["w_enc"].shape
    action_dim = params["w_a2"].shape[1]
    assert action_dim + 1 <= _OUT_VMEM  # TODO(synk): tile the head for action_dim >= 128

    w_enc = params["w_enc"].astype(mxu_dtype)                   # (obs_dim, H)
    b_enc = params["b_enc"].astype(f32)                         # (1, H)

    # fuse actor/critic first layers along the output axis -> (H, 2H)
    w_ac1 = jnp.concatenate([params["w_a1"], params["w_c1"]], axis=1).astype(mxu_dtype)
    b_ac1 = jnp.concatenate([params["b_a1"], params["b_c1"]], axis=1).astype(f32)

    # block-diagonal packed head weight: [[w_a2, 0], [0, w_c2]], lane-padded to 128
    w_out = jnp.zeros((2 * hidden, _OUT_VMEM), f32)
    w_out = w_out.at[:hidden, :action_dim].set(params["w_a2"].astype(f32))
    w_out = w_out.at[hidden:, action_dim:action_dim + 1].set(params["w_c2"].astype(f32))
    b_out = jnp.zeros((1, _OUT_VMEM), f32)
    b_out = b_out.at[:, :action_dim].set(params["b_a2"].astype(f32))
    b_out = b_out.at[:, action_dim:action_dim + 1].set(params["b_c2"].astype(f32))

    return dict(w_enc=w_enc, b_enc=b_enc,
                w_ac1=w_ac1, b_ac1=b_ac1,
                w_out=w_out.astype(mxu_dtype), b_out=b_out,
                obs_dim=int(obs_dim), hidden=int(hidden),
                action_dim=int(action_dim), mxu_dtype=mxu_dtype)


def ppo_actor_critic_forward(obs, packed, *, tb=2048):
    """obs: (B, obs_dim) float. packed: output of pack_params.
    Returns (logits (B, action_dim), value (B,))."""
    B, obs_dim = obs.shape
    assert obs_dim == packed["obs_dim"]
    hidden = packed["hidden"]
    action_dim = packed["action_dim"]
    mxu_dtype = packed["mxu_dtype"]
    f32 = jnp.float32

    out_small = _round_up(action_dim + 1, 8)        # slim HBM writeback slab

    # Batch tiling: tb multiple of 8; ensure >= 2 grid steps when the batch
    # allows it so ("parallel",) can shard across v7x's two TensorCores.
    b8 = _round_up(B, 8)
    tb = max(8, min(_round_up(tb, 8), b8))
    if b8 >= 16 and pl.cdiv(b8, tb) < 2:
        tb = _round_up(pl.cdiv(b8, 2), 8)
    n_tiles = pl.cdiv(B, tb)
    B_pad = n_tiles * tb
    grid = (n_tiles,)

    obs_f = obs.astype(f32)
    if B_pad != B:
        # Padded rows produce garbage outputs; they are sliced off below and
        # cannot affect valid rows (row-wise independent computation).
        obs_f = jnp.pad(obs_f, ((0, B_pad - B), (0, 0)))

    # --- cost hint (post-slimming layout) ------------------------------------
    w_bytes = jnp.dtype(mxu_dtype).itemsize
    flops = 2 * B_pad * (obs_dim * hidden + hidden * 2 * hidden
                         + 2 * hidden * _OUT_VMEM)
    transcendentals = B_pad * (hidden + 2 * hidden + out_small)
    bytes_accessed = (4 * B_pad * obs_dim + 4 * B_pad * out_small
                      + w_bytes * (obs_dim * hidden + hidden * 2 * hidden
                                   + 2 * hidden * _OUT_VMEM)
                      + 4 * (hidden + 2 * hidden + _OUT_VMEM))
    ce = pl.CostEstimate(flops=int(flops), transcendentals=int(transcendentals),
                         bytes_accessed=int(bytes_accessed))

    # --- pallas_call ----------------------------------------------------------
    out = pl.pallas_call(
        functools.partial(_ppo_kernel, action_dim=action_dim,
                          mxu_dtype=mxu_dtype),
        out_shape=jax.ShapeDtypeStruct((B_pad, out_small), f32),
        grid=grid,
        in_specs=[
            pl.BlockSpec((tb, obs_dim), lambda i: (i, 0)),        # streamed obs tile
            pl.BlockSpec((obs_dim, hidden), lambda i: (0, 0)),    # VMEM-resident weights
            pl.BlockSpec((1, hidden), lambda i: (0, 0)),
            pl.BlockSpec((hidden, 2 * hidden), lambda i: (0, 0)),
            pl.BlockSpec((1, 2 * hidden), lambda i: (0, 0)),
            pl.BlockSpec((2 * hidden, _OUT_VMEM), lambda i: (0, 0)),
            pl.BlockSpec((1, _OUT_VMEM), lambda i: (0, 0)),
        ],
        out_specs=pl.BlockSpec((tb, out_small), lambda i: (i, 0)),
        compiler_params=pltpu.CompilerParams(
            dimension_semantics=("parallel",)),
        cost_estimate=ce,
    )(obs_f, packed["w_enc"], packed["b_enc"], packed["w_ac1"],
      packed["b_ac1"], packed["w_out"], packed["b_out"])

    logits = out[:B, :action_dim]
    value = out[:B, action_dim]            # matches torch squeeze(-1)
    return logits, value


def _linear_params(key, in_features, out_features):
    """nn.Linear-style init; W stored as (in, out) (transposed vs torch),
    b stored as (1, out) for clean lane broadcast."""
    k_w, k_b = jax.random.split(key)
    bound = 1.0 / math.sqrt(in_features)
    w = jax.random.uniform(k_w, (in_features, out_features),
                           minval=-bound, maxval=bound, dtype=jnp.float32)
    b = jax.random.uniform(k_b, (1, out_features),
                           minval=-bound, maxval=bound, dtype=jnp.float32)
    return w, b


def make_params(key, obs_dim, action_dim, hidden_size=64):
    keys = jax.random.split(key, 5)
    w_enc, b_enc = _linear_params(keys[0], obs_dim, hidden_size)
    w_a1, b_a1 = _linear_params(keys[1], hidden_size, hidden_size)
    w_a2, b_a2 = _linear_params(keys[2], hidden_size, action_dim)
    w_c1, b_c1 = _linear_params(keys[3], hidden_size, hidden_size)
    w_c2, b_c2 = _linear_params(keys[4], hidden_size, 1)
    return dict(w_enc=w_enc, b_enc=b_enc,
                w_a1=w_a1, b_a1=b_a1,
                w_a2=w_a2, b_a2=b_a2,
                w_c1=w_c1, b_c1=b_c1,
                w_c2=w_c2, b_c2=b_c2)


if __name__ == "__main__":
    # Small shapes consistent with the module (hidden_size default = 64).
    batch, obs_dim, action_dim, hidden = 8, 16, 4, 64

    root = jax.random.PRNGKey(0)
    k_obs, k_params = jax.random.split(root)

    obs = jax.random.normal(k_obs, (batch, obs_dim), dtype=jnp.float32)
    params = make_params(k_params, obs_dim, action_dim, hidden_size=hidden)

    # Pure-JAX reference (unfused, unpadded) to verify kernel semantics.
    h = jnp.tanh(obs @ params["w_enc"] + params["b_enc"])
    a = jnp.tanh(h @ params["w_a1"] + params["b_a1"])
    ref_logits = jnp.tanh(a @ params["w_a2"] + params["b_a2"])
    c = jnp.tanh(h @ params["w_c1"] + params["b_c1"])
    ref_value = (c @ params["w_c2"] + params["b_c2"])[:, 0]

    # 1) f32 MXU operands: strict semantics check.
    packed_f32 = pack_params(params, mxu_dtype=jnp.float32)
    logits, value = ppo_actor_critic_forward(obs, packed_f32)
    jax.block_until_ready((logits, value))
    assert logits.shape == (batch, action_dim)
    assert value.shape == (batch,)
    assert jnp.allclose(logits, ref_logits, atol=1e-5, rtol=1e-5)
    assert jnp.allclose(value, ref_value, atol=1e-5, rtol=1e-5)

    # 2) default bf16 MXU operands (perf path on v5e/v6e/v7x): loose sanity
    #    check vs the f32 reference (tolerance reflects bf16 operand rounding).
    packed_bf16 = pack_params(params)                 # mxu_dtype = bfloat16
    logits16, value16 = ppo_actor_critic_forward(obs, packed_bf16)
    jax.block_until_ready((logits16, value16))
    assert logits16.shape == (batch, action_dim)
    assert value16.shape == (batch,)
    assert jnp.allclose(logits16, ref_logits, atol=1e-1)
    assert jnp.allclose(value16, ref_value, atol=1e-1)

    print("KERNEL_OK")
</pallas_src>

<mosaic_0001>
module attributes {stable_mosaic.version = 11 : i64} {
  func.func @_ppo_kernel(%arg0: i32, %arg1: memref<8x16xf32, #tpu.memory_space<vmem>>, %arg2: memref<16x64xf32, #tpu.memory_space<vmem>>, %arg3: memref<1x64xf32, #tpu.memory_space<vmem>>, %arg4: memref<64x128xf32, #tpu.memory_space<vmem>>, %arg5: memref<1x128xf32, #tpu.memory_space<vmem>>, %arg6: memref<128x128xf32, #tpu.memory_space<vmem>>, %arg7: memref<1x128xf32, #tpu.memory_space<vmem>>, %arg8: memref<8x8xf32, #tpu.memory_space<vmem>>) attributes {dimension_semantics = [#tpu.dimension_semantics<parallel>], iteration_bounds = array<i64: 1>, scalar_prefetch = 0 : i64, scratch_operands = 0 : i64, tpu.core_type = #tpu.core_type<tc>, window_params = [{transform_indices = @transform_0, window_bounds = array<i64: 8, 16>}, {pipeline_mode = #tpu.pipeline_mode<synchronous>, transform_indices = @transform_1, window_bounds = array<i64: 16, 64>}, {pipeline_mode = #tpu.pipeline_mode<synchronous>, transform_indices = @transform_2, window_bounds = array<i64: 1, 64>}, {pipeline_mode = #tpu.pipeline_mode<synchronous>, transform_indices = @transform_3, window_bounds = array<i64: 64, 128>}, {pipeline_mode = #tpu.pipeline_mode<synchronous>, transform_indices = @transform_4, window_bounds = array<i64: 1, 128>}, {pipeline_mode = #tpu.pipeline_mode<synchronous>, transform_indices = @transform_5, window_bounds = array<i64: 128, 128>}, {pipeline_mode = #tpu.pipeline_mode<synchronous>, transform_indices = @transform_6, window_bounds = array<i64: 1, 128>}, {transform_indices = @transform_7, window_bounds = array<i64: 8, 8>}]} {
    %c0 = arith.constant 0 : index
    %c0_0 = arith.constant 0 : index
    %0 = vector.load %arg1[%c0, %c0_0] : memref<8x16xf32, #tpu.memory_space<vmem>>, vector<8x16xf32>
    %c0_1 = arith.constant 0 : index
    %c0_2 = arith.constant 0 : index
    %1 = vector.load %arg2[%c0_1, %c0_2] : memref<16x64xf32, #tpu.memory_space<vmem>>, vector<16x64xf32>
    %cst = arith.constant dense<0.000000e+00> : vector<8x64xf32>
    %2 = tpu.matmul %0, %1, %cst {dimension_numbers = #tpu.dot_dimension_numbers<[1], [0], [0], [1], [0, 0, 1, 1], [], []>} : vector<8x16xf32>, vector<16x64xf32>, vector<8x64xf32> -> vector<8x64xf32>
    %c0_3 = arith.constant 0 : index
    %c0_4 = arith.constant 0 : index
    %3 = vector.load %arg3[%c0_3, %c0_4] : memref<1x64xf32, #tpu.memory_space<vmem>>, vector<1x64xf32>
    %4 = vector.broadcast %3 : vector<1x64xf32> to vector<8x64xf32>
    %5 = arith.addf %2, %4 : vector<8x64xf32>
    %6 = math.tanh %5 : vector<8x64xf32>
    %c0_5 = arith.constant 0 : index
    %c0_6 = arith.constant 0 : index
    %7 = vector.load %arg4[%c0_5, %c0_6] : memref<64x128xf32, #tpu.memory_space<vmem>>, vector<64x128xf32>
    %cst_7 = arith.constant dense<0.000000e+00> : vector<8x128xf32>
    %8 = tpu.matmul %6, %7, %cst_7 {dimension_numbers = #tpu.dot_dimension_numbers<[1], [0], [0], [1], [0, 0, 1, 1], [], []>} : vector<8x64xf32>, vector<64x128xf32>, vector<8x128xf32> -> vector<8x128xf32>
    %c0_8 = arith.constant 0 : index
    %c0_9 = arith.constant 0 : index
    %9 = vector.load %arg5[%c0_8, %c0_9] : memref<1x128xf32, #tpu.memory_space<vmem>>, vector<1x128xf32>
    %10 = vector.broadcast %9 : vector<1x128xf32> to vector<8x128xf32>
    %11 = arith.addf %8, %10 : vector<8x128xf32>
    %12 = math.tanh %11 : vector<8x128xf32>
    %c0_10 = arith.constant 0 : index
    %c0_11 = arith.constant 0 : index
    %13 = vector.load %arg6[%c0_10, %c0_11] : memref<128x128xf32, #tpu.memory_space<vmem>>, vector<128x128xf32>
    %cst_12 = arith.constant dense<0.000000e+00> : vector<8x128xf32>
    %14 = tpu.matmul %12, %13, %cst_12 {dimension_numbers = #tpu.dot_dimension_numbers<[1], [0], [0], [1], [0, 0, 1, 1], [], []>} : vector<8x128xf32>, vector<128x128xf32>, vector<8x128xf32> -> vector<8x128xf32>
    %c0_13 = arith.constant 0 : index
    %c0_14 = arith.constant 0 : index
    %15 = vector.load %arg7[%c0_13, %c0_14] : memref<1x128xf32, #tpu.memory_space<vmem>>, vector<1x128xf32>
    %16 = vector.broadcast %15 : vector<1x128xf32> to vector<8x128xf32>
    %17 = arith.addf %14, %16 : vector<8x128xf32>
    %18 = vector.extract_strided_slice %17 {offsets = [0, 0], sizes = [8, 8], strides = [1, 1]} : vector<8x128xf32> to vector<8x8xf32>
    %19 = tpu.iota {dimensions = array<i32: 1>} : vector<8x8xi32>
    %c4_i32 = arith.constant 4 : i32
    %20 = vector.broadcast %c4_i32 : i32 to vector<8x8xi32>
    %21 = arith.cmpi slt, %19, %20 : vector<8x8xi32>
    %22 = math.tanh %18 : vector<8x8xf32>
    %23 = arith.select %21, %22, %18 : vector<8x8xi1>, vector<8x8xf32>
    %c0_15 = arith.constant 0 : index
    %c0_16 = arith.constant 0 : index
    %24 = vector.load %arg8[%c0_15, %c0_16] : memref<8x8xf32, #tpu.memory_space<vmem>>, vector<8x8xf32>
    tpu.vector_store %arg8[%c0_15, %c0_16], %23 {strides = array<i32>} : memref<8x8xf32, #tpu.memory_space<vmem>>, vector<8x8xf32>,
    return
  }
  func.func @transform_0(%arg0: i32) -> (i32, i32) {
    %c0_i32 = arith.constant 0 : i32
    %c0_i32_0 = arith.constant 0 : i32
    return %arg0, %c0_i32 : i32, i32
  }
  func.func @transform_1(%arg0: i32) -> (i32, i32) {
    %c0_i32 = arith.constant 0 : i32
    %c0_i32_0 = arith.constant 0 : i32
    %c0_i32_1 = arith.constant 0 : i32
    return %c0_i32, %c0_i32_0 : i32, i32
  }
  func.func @transform_2(%arg0: i32) -> (i32, i32) {
    %c0_i32 = arith.constant 0 : i32
    %c0_i32_0 = arith.constant 0 : i32
    %c0_i32_1 = arith.constant 0 : i32
    return %c0_i32, %c0_i32_0 : i32, i32
  }
  func.func @transform_3(%arg0: i32) -> (i32, i32) {
    %c0_i32 = arith.constant 0 : i32
    %c0_i32_0 = arith.constant 0 : i32
    %c0_i32_1 = arith.constant 0 : i32
    return %c0_i32, %c0_i32_0 : i32, i32
  }
  func.func @transform_4(%arg0: i32) -> (i32, i32) {
    %c0_i32 = arith.constant 0 : i32
    %c0_i32_0 = arith.constant 0 : i32
    %c0_i32_1 = arith.constant 0 : i32
    return %c0_i32, %c0_i32_0 : i32, i32
  }
  func.func @transform_5(%arg0: i32) -> (i32, i32) {
    %c0_i32 = arith.constant 0 : i32
    %c0_i32_0 = arith.constant 0 : i32
    %c0_i32_1 = arith.constant 0 : i32
    return %c0_i32, %c0_i32_0 : i32, i32
  }
  func.func @transform_6(%arg0: i32) -> (i32, i32) {
    %c0_i32 = arith.constant 0 : i32
    %c0_i32_0 = arith.constant 0 : i32
    %c0_i32_1 = arith.constant 0 : i32
    return %c0_i32, %c0_i32_0 : i32, i32
  }
  func.func @transform_7(%arg0: i32) -> (i32, i32) {
    %c0_i32 = arith.constant 0 : i32
    %c0_i32_0 = arith.constant 0 : i32
    return %arg0, %c0_i32 : i32, i32
  }
}

</mosaic_0001>

<bundles_post_ra>
// kernel: tpu_custom_call.1
= control target key start
LH: loop header
LB: loop body
LE: loop exit
PB: predicated region body
PF: predicated region fallthrough
CT: control target
= control target key end

     0   :  { %12 = vsyncpa [#allocation3], 0  ;;  %s701_s0 = inlined_call_operand.hbm [shape: f32[8,16], index: 0, kind: input, shape index: {}]   ;;  %s702_s1 = inlined_call_operand.hbm [shape: f32[16,64], index: 1, kind: input, shape index: {}]   ;;  %s703_s2 = inlined_call_operand.vmem [shape: f32[1,64], index: 2, kind: input, shape index: {}]   ;;  %s704_s3 = inlined_call_operand.hbm [shape: f32[64,128], index: 3, kind: input, shape index: {}]   ;;  %s705_s4 = inlined_call_operand.vmem [shape: f32[1,128], index: 4, kind: input, shape index: {}]   ;;  %s706_s5 = inlined_call_operand.hbm [shape: f32[128,128], index: 5, kind: input, shape index: {}]   ;;  %s707_s6 = inlined_call_operand.vmem [shape: f32[1,128], index: 6, kind: input, shape index: {}]   ;;  %s708_s7 = inlined_call_operand.hbm [shape: f32[8,8], index: 7, kind: output, shape index: {}]  }
   0x1   :  { %13 = vsyncpa [#allocation6], 0 }
   0x2   :  { %14 = vsyncpa [#allocation9], 0 }
   0x3   :  { %15 = vsyncpa [#allocation4], 0  ;;  %s590_s24 = smov [#allocation5]  }
   0x4   :  { %s31_s25 = sshll.u32 %s590_s24, 4  ;;  %s32_s25 = int_to_ptr.vmem [resolvable:$true] %s31_s25 }
   0x5   :  { %s490_s26 = scalar_lea.vmem %s32_s25, 256  ;;  %p495_p1 = scmp.lt.s32.totalorder %s32_s25, %s32_s25 }
   0x6   :  { %p491_p0 = scmp.ne.s32.totalorder %s32_s25, %s490_s26  ;;  %p496_p2 = scmp.lt.s32.totalorder %s490_s26, %s490_s26 }
   0x8   :  { %p497_p3 = por %p496_p2, %p495_p1 }
   0xa   :  { %p498_p4 = pnand %p497_p3, %p491_p0 }
   0xc   :  { %501 = shalt.err (!%p498_p4)
}
   0xd   :  { %s591_s27 = smov 128   ;;  %s592_s28 = smov 8  }
   0xe   :  { %37 = dma.hbm_to_vmem [thread:$0]  %s702_s1, 256, %s32_s25, [#allocation6], %s591_s27, %s591_s27, %s592_s28  }
   0xf   :  { %s593_s8 = smov [#allocation2]   ;;  %s594_s10 = smov [#allocation7]  }
  0x10   :  { %s22_s9 = sshll.u32 %s593_s8, 4  ;;  %s45_s11 = sshll.u32 %s594_s10, 4  ;;  %s23_s9 = int_to_ptr.vmem [resolvable:$true] %s22_s9  ;;  %s46_s11 = int_to_ptr.vmem [resolvable:$true] %s45_s11 }
  0x11   :  { %s510_s12 = scalar_lea.vmem %s23_s9, 128  ;;  %p515_p6 = scmp.lt.s32.totalorder %s23_s9, %s23_s9 }
  0x12   :  { %p511_p5 = scmp.ne.s32.totalorder %s23_s9, %s510_s12  ;;  %p516_p7 = scmp.lt.s32.totalorder %s510_s12, %s510_s12 }
  0x14   :  { %p517_p8 = por %p516_p7, %p515_p6 }
  0x16   :  { %p518_p9 = pnand %p517_p8, %p511_p5 }
  0x18   :  { %521 = shalt.err (!%p518_p9)
}
  0x19   :  { %25 = dma.hbm_to_vmem [thread:$0]  %s701_s0, 128, %s23_s9, [#allocation3]  }
  0x1a   :  { %s530_s15 = scalar_lea.vmem %s46_s11, 1024  ;;  %p535_p11 = scmp.lt.s32.totalorder %s46_s11, %s46_s11 }
  0x1b   :  { %p531_p10 = scmp.ne.s32.totalorder %s46_s11, %s530_s15  ;;  %p536_p12 = scmp.lt.s32.totalorder %s530_s15, %s530_s15 }
  0x1d   :  { %p537_p13 = por %p536_p12, %p535_p11 }
  0x1f   :  { %p538_p0 = pnand %p537_p13, %p531_p10 }
  0x21   :  { %541 = shalt.err (!%p538_p0)
}
  0x22   :  { %51 = dma.hbm_to_vmem [thread:$0]  %s704_s3, 1024, %s46_s11, [#allocation6], %s591_s27, %s591_s27, %s592_s28  }
  0x23   :  { %s595_s17 = smov [#allocation8]  }
  0x24   :  { %s59_s18 = sshll.u32 %s595_s17, 4  ;;  %s60_s18 = int_to_ptr.vmem [resolvable:$true] %s59_s18 }
  0x25   :  { %s550_s19 = scalar_lea.vmem %s60_s18, 2048  ;;  %p555_p2 = scmp.lt.s32.totalorder %s60_s18, %s60_s18 }
  0x26   :  { %p551_p1 = scmp.ne.s32.totalorder %s60_s18, %s550_s19  ;;  %p556_p3 = scmp.lt.s32.totalorder %s550_s19, %s550_s19 }
  0x28   :  { %p557_p4 = por %p556_p3, %p555_p2 }
  0x2a   :  { %p558_p5 = pnand %p557_p4, %p551_p1 }
  0x2c   :  { %561 = shalt.err (!%p558_p5)
}
  0x2d   :  { %65 = dma.hbm_to_vmem [thread:$0]  %s706_s5, 2048, %s60_s18, [#allocation9], %s591_s27, %s591_s27, %s592_s28  }
  0x2e   :  { %582 = dma.done.wait [#allocation3], 128  }
  0x2f   :  { %583 = vsyncadd [#allocation3], 4294967168 }
  0x30   :  { %584 = dma.done.wait [#allocation6], 1280  }
  0x31   :  { %585 = vsyncadd [#allocation6], 4294966016 }
  0x32   :  { %586 = dma.done.wait [#allocation9], 2048  }
  0x33   :  { %587 = vsyncadd [#allocation9], 4294965248  ;;  %v596_v0 = vmov 0.0   ;;  %vm597_vm0 = vmmov 0   ;;  %v82_v1 = vld [vmem:[#allocation5 + $0x8] sm:$0xff]  ;;  %v81_v2 = vld [vmem:[#allocation5] sm:$0xff]  ;;  %v348_v42 = vlaneseq }
  0x34   :  { %406 = vmatprep.subr.mxu1 %v596_v0  ;;  %410 = vmatprep.mubr.msk.f32.mxu1 %vm597_vm0, %v596_v0  ;;  %v80_v3 = vld [vmem:[#allocation2] sm:$0xff]  ;;  %vm90_vm1 = vcmask 130048   ;;  %v172_v4 = vld [vmem:[#allocation7 + $0x38] sm:$0xff]  ;;  %v171_v5 = vld [vmem:[#allocation7 + $0x30] sm:$0xff]  ;;  %vm180_vm2 = vcmask 523264   ;;  %s598_s24 = smov [#allocation10]  }
  0x35   :  { %432 = vmatprep.subr.mxu0 %v596_v0  ;;  %464 = vmatprep.mubr.msk.f32.mxu0 %vm597_vm0, %v596_v0  ;;  %v170_v6 = vld [vmem:[#allocation7 + $0x28] sm:$0xff]  ;;  %v169_v7 = vld [vmem:[#allocation7 + $0x20] sm:$0xff]  ;;  %v168_v8 = vld [vmem:[#allocation7 + $0x18] sm:$0xff]  ;;  %v349_v43 = vand.u32 127, %v348_v42  ;;  %s361_s25 = sshll.u32 %s598_s24, 4  ;;  %vm353_vm4 = vcmask 64512   ;;  %s362_s25 = int_to_ptr.vmem [resolvable:$true] %s361_s25 }
  0x36   :  { %407 = vmatpush3.msra.mxu1 %v82_v1  ;;  %v167_v9 = vld [vmem:[#allocation7 + $0x10] sm:$0xff]  ;;  %v166_v10 = vld [vmem:[#allocation7 + $0x8] sm:$0xff]  ;;  %v165_v11 = vld [vmem:[#allocation7] sm:$0xff]  ;;  %p567_p7 = scmp.lt.s32.totalorder %s362_s25, %s362_s25 }
  0x37   :  { %408 = vmatprep.subr.mxu1 %v596_v0  ;;  %v270_v12 = vld [vmem:[#allocation8 + $0x78] sm:$0xff]  ;;  %v269_v13 = vld [vmem:[#allocation8 + $0x70] sm:$0xff]  ;;  %v268_v14 = vld [vmem:[#allocation8 + $0x68] sm:$0xff]  ;;  %vm350_vm3 = vcmp.lt.s32.totalorder %v349_v43, 4 }
  0x38   :  { %409 = vmatpush3.msra.mxu1 %v81_v2  ;;  %433 = vmatpush3.msra.mxu0 %v270_v12  ;;  %v267_v15 = vld [vmem:[#allocation8 + $0x60] sm:$0xff]  ;;  %v266_v16 = vld [vmem:[#allocation8 + $0x58] sm:$0xff]  ;;  %v265_v17 = vld [vmem:[#allocation8 + $0x50] sm:$0xff] }
  0x39   :  { %411 = vmatmul.mubr.msk.f32.vlgmr.msra.gmra.mxu1 %vm90_vm1, %v80_v3  ;;  %413 = vmatprep.subr.mxu1 %v596_v0  ;;  %v264_v18 = vld [vmem:[#allocation8 + $0x48] sm:$0xff]  ;;  %v263_v24 = vld [vmem:[#allocation8 + $0x40] sm:$0xff]  ;;  %v262_v25 = vld [vmem:[#allocation8 + $0x38] sm:$0xff] }
  0x3a   :  { %429 = vmatprep.mubr.msk.f32.mxu1 %vm597_vm0, %v596_v0  ;;  %414 = vmatpush3.msra.mxu1 %v172_v4  ;;  %v372_v19 = vld [vmem:[%s703_s2] ss:$0 sm:$0xff]  ;;  %v261_v26 = vld [vmem:[#allocation8 + $0x30] sm:$0xff]  ;;  %v259_v28 = vld [vmem:[#allocation8 + $0x20] sm:$0xff] }
  0x3b   :  { %415 = vmatprep.subr.mxu1 %v596_v0  ;;  %434 = vmatprep.subr.mxu0 %v596_v0  ;;  %v260_v27 = vld [vmem:[#allocation8 + $0x28] sm:$0xff]  ;;  %v258_v29 = vld [vmem:[#allocation8 + $0x18] sm:$0xff]  ;;  %v257_v30 = vld [vmem:[#allocation8 + $0x10] sm:$0xff] }
  0x3c   :  { %416 = vmatpush3.msra.mxu1 %v171_v5  ;;  %435 = vmatpush3.msra.mxu0 %v269_v13  ;;  %v256_v31 = vld [vmem:[#allocation8 + $0x8] sm:$0xff]  ;;  %v255_v32 = vld [vmem:[#allocation8] sm:$0xff] }
  0x3d   :  { %417 = vmatprep.subr.mxu1 %v596_v0  ;;  %436 = vmatprep.subr.mxu0 %v596_v0  ;;  %v374_v33 = vld [vmem:[%s705_s4] ss:$0 sm:$0xff]  ;;  %s562_s4 = scalar_lea.vmem %s362_s25, 128 }
  0x3e   :  { %418 = vmatpush3.msra.mxu1 %v170_v6  ;;  %437 = vmatpush3.msra.mxu0 %v268_v14  ;;  %v376_v38 = vld [vmem:[%s707_s6] ss:$0 sm:$0xff]  ;;  %p563_p6 = scmp.ne.s32.totalorder %s362_s25, %s562_s4  ;;  %p568_p8 = scmp.lt.s32.totalorder %s562_s4, %s562_s4 }
  0x3f   :  { %419 = vmatprep.subr.mxu1 %v596_v0  ;;  %438 = vmatprep.subr.mxu0 %v596_v0 }
  0x40   :  { %420 = vmatpush3.msra.mxu1 %v169_v7  ;;  %439 = vmatpush3.msra.mxu0 %v267_v15  ;;  %p569_p9 = por %p568_p8, %p567_p7 }
  0x41   :  { %421 = vmatprep.subr.mxu1 %v596_v0  ;;  %440 = vmatprep.subr.mxu0 %v596_v0 }
  0x42   :  { %422 = vmatpush3.msra.mxu1 %v168_v8  ;;  %441 = vmatpush3.msra.mxu0 %v266_v16  ;;  %p570_p10 = pnand %p569_p9, %p563_p6 }
  0x43   :  { %423 = vmatprep.subr.mxu1 %v596_v0  ;;  %442 = vmatprep.subr.mxu0 %v596_v0 }
  0x44   :  { %424 = vmatpush3.msra.mxu1 %v167_v9  ;;  %443 = vmatpush3.msra.mxu0 %v265_v17 }
  0x45   :  { %425 = vmatprep.subr.mxu1 %v596_v0  ;;  %444 = vmatprep.subr.mxu0 %v596_v0 }
  0x46   :  { %426 = vmatpush3.msra.mxu1 %v166_v10  ;;  %445 = vmatpush3.msra.mxu0 %v264_v18 }
  0x47   :  { %427 = vmatprep.subr.mxu1 %v596_v0  ;;  %446 = vmatprep.subr.mxu0 %v596_v0 }
  0x48   :  { %428 = vmatpush3.msra.mxu1 %v165_v11  ;;  %447 = vmatpush3.msra.mxu0 %v263_v24 }
  0x49   :  { %448 = vmatprep.subr.mxu0 %v596_v0 }
  0x4a   :  { %449 = vmatpush3.msra.mxu0 %v262_v25 }
  0x4b   :  { %450 = vmatprep.subr.mxu0 %v596_v0 }
  0x4c   :  { %451 = vmatpush3.msra.mxu0 %v261_v26 }
  0x4d   :  { %452 = vmatprep.subr.mxu0 %v596_v0 }
  0x4e   :  { %453 = vmatpush3.msra.mxu0 %v260_v27 }
  0x4f   :  { %454 = vmatprep.subr.mxu0 %v596_v0 }
  0x50   :  { %455 = vmatpush3.msra.mxu0 %v259_v28 }
  0x51   :  { %456 = vmatprep.subr.mxu0 %v596_v0 }
  0x52   :  { %457 = vmatpush3.msra.mxu0 %v258_v29 }
  0x53   :  { %458 = vmatprep.subr.mxu0 %v596_v0 }
  0x54   :  { %459 = vmatpush3.msra.mxu0 %v257_v30 }
  0x55   :  { %460 = vmatprep.subr.mxu0 %v596_v0 }
  0x56   :  { %461 = vmatpush3.msra.mxu0 %v256_v31 }
  0x57   :  { %462 = vmatprep.subr.mxu0 %v596_v0 }
  0x58   :  { %463 = vmatpush3.msra.mxu0 %v255_v32 }
  0xf9   :  { %v160_v20 = vpop.f32.mrf.mxu1 }
  0xfa   :  { %v161_v21 = vadd.f32 %v372_v19, %v160_v20 }
  0xfb   :  { %v412_v22 = vpop.f32.mrf.mxu1 }
  0xfc   :  { %476 = vtanh.f32 %v161_v21 }
 0x109   :  { %v477_v23 = vpop.eup %476 }
 0x10a   :  { %430 = vmatmul.mubr.msk.f32.vlgmr.msra.gmra.mxu1 %vm180_vm2, %v477_v23 }
 0x1ca   :  { %v250_v34 = vpop.f32.mrf.mxu1 }
 0x1cb   :  { %v251_v35 = vadd.f32 %v374_v33, %v250_v34 }
 0x1cc   :  { %v431_v36 = vpop.f32.mrf.mxu1 }
 0x1cd   :  { %478 = vtanh.f32 %v251_v35 }
 0x1da   :  { %v479_v37 = vpop.eup %478 }
 0x1db   :  { %465 = vmatmul.mubr.f32.vlgmr.msra.gmra.mxu0 %v479_v37 }
 0x29b   :  { %v344_v39 = vpop.f32.mrf.mxu0 }
 0x29c   :  { %v345_v40 = vadd.f32 %v376_v38, %v344_v39 }
 0x29d   :  { %v466_v41 = vpop.f32.mrf.mxu0 }
 0x29e   :  { %480 = vtanh.f32 %v345_v40 }
 0x2ab   :  { %v481_v44 = vpop.eup %480 }
 0x2ac   :  { %v352_v45 = vsel %vm350_vm3, %v481_v44, %v345_v40 }
 0x2ad   :  { %354 = vst.msk [vmem:[#allocation10] sm:$0xff] %vm353_vm4, %v352_v45 }
 0x2ae   :  { %573 = shalt.err (!%p570_p10)
}
 0x2af   :  { %364 = dma.vmem_to_hbm [thread:$0]  %s362_s25, 128, %s708_s7, [#allocation4]  }
 0x2b0   :  { %588 = dma.done.wait [#allocation4], 128  }
 0x2b1   :  { %589 = vsyncadd [#allocation4], 4294967168 }
 0x2b2   :  { %368 = vsyncpa [#allocation3], 1 }
 0x2b3   :  { %369 = vsyncpa [#allocation6], 1 }
 0x2b4   :  { %370 = vsyncpa [#allocation9], 1 }
 0x2b5   :  { %371 = vsyncpa [#allocation4], 1 }

</bundles_post_ra>
